<compile_context>
chip_gen: v5e
topology: v5e:2x2
jax: 0.10.0
libtpu: 0.0.40
codegen_flags: <defaults>
</compile_context>

<pallas_src>
import jax
import jax.numpy as jnp
from jax.experimental import pallas as pl
from jax.experimental.pallas import tpu as pltpu


def _identity_copy_kernel(x_ref, o_ref):
    # Hot path: stream one lane-dense row block VMEM->VMEM (HBM<->VMEM DMAs are
    # handled by the BlockSpec pipeline).
    o_ref[...] = x_ref[...]


def _choose_lane_dense_2d(total: int) -> tuple[int, int]:
    """Pick a (rows, lanes) factorization with a wide, 128-multiple last dim."""
    # Prefer >= 8 sublanes with the widest lane dimension available.
    for lane in (4096, 2048, 1024, 512, 256, 128):
        if total % lane == 0 and total // lane >= 8:
            return total // lane, lane
    for lane in (4096, 2048, 1024, 512, 256, 128):
        if total % lane == 0:
            return total // lane, lane
    # Fallback: one row covering everything (block dims == full array dims).
    return 1, total


# ~2 MiB per tile: with 2 operands x 2 pipeline buffers this is ~8 MiB of VMEM,
# comfortably inside v7x's 64 MiB (and v5e/v6e's 128 MiB) while being well past
# the measured mem-bound roofline plateau (512+ wide tiles).
_BLOCK_TARGET_BYTES = 2 * 1024 * 1024


def base_lr_feat_extractor_forward(x: jax.Array) -> jax.Array:
    """Pallas implementation of BaseLRFeatExtractor.forward (interface identity).

    x: array of shape (N, C, H, W) -- NCHW, matching PyTorch.
    returns: array of the same shape/dtype.
    """
    orig_shape = x.shape
    total = int(x.size)
    itemsize = jnp.dtype(x.dtype).itemsize

    # Wrapper-side reshape to a lane-dense 2D slab (layout plumbing only).
    m, lane = _choose_lane_dense_2d(total)
    x2 = x.reshape(m, lane)

    # Row-block size: as many rows as fit the byte budget, multiple of 8
    # sublanes (unless a single block covers the whole slab).
    rows_per_block = max(1, _BLOCK_TARGET_BYTES // (lane * itemsize))
    if rows_per_block >= m:
        tm = m
    else:
        tm = min(m, max(8, (rows_per_block // 8) * 8))
    grid = (pl.cdiv(m, tm),)

    out2 = pl.pallas_call(
        _identity_copy_kernel,
        out_shape=jax.ShapeDtypeStruct((m, lane), x.dtype),
        grid=grid,
        in_specs=[pl.BlockSpec((tm, lane), lambda i: (i, 0))],
        out_specs=pl.BlockSpec((tm, lane), lambda i: (i, 0)),
        # Identity: let the output alias the input HBM buffer (true no-op when
        # the caller donates x; otherwise XLA inserts a protective copy).
        input_output_aliases={0: 0},
        compiler_params=pltpu.CompilerParams(
            dimension_semantics=("parallel",),
        ),
        cost_estimate=pl.CostEstimate(
            flops=0,
            transcendentals=0,
            bytes_accessed=2 * total * itemsize,
        ),
    )(x2)

    return out2.reshape(orig_shape)


if __name__ == "__main__":
    key = jax.random.PRNGKey(0)
    # Small NCHW input consistent with a low-resolution feature extractor input.
    x = jax.random.normal(key, (2, 4, 16, 16), dtype=jnp.float32)

    y = base_lr_feat_extractor_forward(x)
    y = jax.block_until_ready(y)

    # Interface contract check: identity pass-through of the NCHW tensor.
    assert y.shape == x.shape and y.dtype == x.dtype
    assert bool(jnp.allclose(y, x))

    print("KERNEL_OK")
</pallas_src>

<mosaic_0001>
module attributes {stable_mosaic.version = 11 : i64} {
  func.func @_identity_copy_kernel(%arg0: i32, %arg1: memref<8x256xf32, #tpu.memory_space<vmem>>, %arg2: memref<8x256xf32, #tpu.memory_space<vmem>>) attributes {dimension_semantics = [#tpu.dimension_semantics<parallel>], iteration_bounds = array<i64: 1>, scalar_prefetch = 0 : i64, scratch_operands = 0 : i64, tpu.core_type = #tpu.core_type<tc>, window_params = [{transform_indices = @transform_0, window_bounds = array<i64: 8, 256>}, {transform_indices = @transform_1, window_bounds = array<i64: 8, 256>}]} {
    %c0 = arith.constant 0 : index
    %c0_0 = arith.constant 0 : index
    %0 = vector.load %arg1[%c0, %c0_0] : memref<8x256xf32, #tpu.memory_space<vmem>>, vector<8x256xf32>
    %c0_1 = arith.constant 0 : index
    %c0_2 = arith.constant 0 : index
    %1 = vector.load %arg2[%c0_1, %c0_2] : memref<8x256xf32, #tpu.memory_space<vmem>>, vector<8x256xf32>
    tpu.vector_store %arg2[%c0_1, %c0_2], %0 {strides = array<i32>} : memref<8x256xf32, #tpu.memory_space<vmem>>, vector<8x256xf32>,
    return
  }
  func.func @transform_0(%arg0: i32) -> (i32, i32) {
    %c0_i32 = arith.constant 0 : i32
    %c0_i32_0 = arith.constant 0 : i32
    return %arg0, %c0_i32 : i32, i32
  }
  func.func @transform_1(%arg0: i32) -> (i32, i32) {
    %c0_i32 = arith.constant 0 : i32
    %c0_i32_0 = arith.constant 0 : i32
    return %arg0, %c0_i32 : i32, i32
  }
}

</mosaic_0001>

<bundles_post_ra>
// kernel: tpu_custom_call.1
= control target key start
LH: loop header
LB: loop body
LE: loop exit
PB: predicated region body
PF: predicated region fallthrough
CT: control target
= control target key end

     0   :  { %6 = vsyncpa [#allocation3], 0  ;;  %s116_s0 = inlined_call_operand.hbm [shape: f32[8,256], index: 0, kind: input, shape index: {}, may-alias: {0,1}]   ;;  %s117_s1 = inlined_call_operand.hbm [shape: f32[8,256], index: 1, kind: output, shape index: {}, may-alias: {0,1}]  }
   0x1   :  { %7 = vsyncpa [#allocation4], 0  ;;  %s13_s8 = sshll.u32 %s116_s0, 4  ;;  %s98_s9 = smov [#allocation2]   ;;  %s14_s8 = int_to_ptr.hbm [resolvable:$true] %s13_s8 }
   0x2   :  { %s15_s10 = sshll.u32 %s98_s9, 4  ;;  %s16_s10 = int_to_ptr.vmem [resolvable:$true] %s15_s10 }
   0x3   :  { %18 = dma.hbm_to_vmem [thread:$0]  %s14_s8, 256, %s16_s10, [#allocation3]  }
   0x4   :  { %94 = dma.done.wait [#allocation3], 256  }
   0x5   :  { %95 = vsyncadd [#allocation3], 4294967040  ;;  %s99_s11 = smov [#allocation5]   ;;  %s34_s15 = sshll.u32 %s117_s1, 4  ;;  %v23_v0 = vld [vmem:[#allocation2] sm:$0xff]  ;;  %v24_v1 = vld [vmem:[#allocation2 + $0x8] sm:$0xff]  ;;  %s35_s15 = int_to_ptr.hbm [resolvable:$true] %s34_s15 }
   0x6   :  { %s32_s12 = sshll.u32 %s99_s11, 4  ;;  %25 = vst [vmem:[#allocation5] sm:$0xff] %v23_v0  ;;  %s33_s12 = int_to_ptr.vmem [resolvable:$true] %s32_s12 }
   0x7   :  { %26 = vst [vmem:[#allocation5 + $0x8] sm:$0xff] %v24_v1 }
   0x8   :  { %37 = dma.vmem_to_hbm [thread:$0]  %s33_s12, 256, %s35_s15, [#allocation4]  }
   0x9   :  { %96 = dma.done.wait [#allocation4], 256  }
   0xa   :  { %97 = vsyncadd [#allocation4], 4294967040 }
   0xb   :  { %42 = vsyncpa [#allocation3], 1 }
   0xc   :  { %43 = vsyncpa [#allocation4], 1 }

</bundles_post_ra>
